<compile_context>
chip_gen: v7x
topology: tpu7x:2x2x1
jax: 0.10.0
libtpu: 0.0.40
codegen_flags: <defaults>
</compile_context>

<pallas_src>
import functools

import jax
import jax.numpy as jnp
from jax.experimental import pallas as pl
from jax.experimental.pallas import tpu as pltpu


# ---------------------------------------------------------------------------
# tiling helpers
# ---------------------------------------------------------------------------
def _sublane_align(dtype):
    """Packed-tile sublane alignment: 8 for f32, 16 for bf16, 32 for int8/fp8."""
    return max(8, 32 // jnp.dtype(dtype).itemsize)


def _pick_tile(n, align, max_tile):
    """Largest t <= max_tile with t % align == 0 and n % t == 0; else full n."""
    if n <= max_tile:
        return n
    t = (max_tile // align) * align
    while t >= align:
        if n % t == 0:
            return t
        t -= align
    return n


def _pick_hw_tile(hw, max_elems):
    """Lane tile for the flattened spatial axis.

    Prefer an exact 128-aligned divisor (no masking); otherwise use a 128-aligned
    tile that fits the budget and mask the ragged last block in-kernel (zero padding
    is exact for a sum).  Tiny HW -> full dimension.
    Returns (hw_tile, needs_mask).
    """
    if hw <= max_elems:
        return hw, False
    cap = max(128, (max_elems // 128) * 128)
    t = cap
    while t >= 128:
        if hw % t == 0:
            return t, False
        t -= 128
    return cap, True


# ---------------------------------------------------------------------------
# phase 1: streaming spatial sum + (hoisted) 1x1 conv -> per-core partials
# ---------------------------------------------------------------------------
def _reduce_kernel(x_ref, wT_ref, part_ref, hw_acc_ref, y_acc_ref,
                   *, hw_total, hw_tile, mask_hw):
    """x_ref:      (B, c1_tile, hw_tile)  input tile (lane axis = H*W)
       wT_ref:     (c1_tile, C2)          pre-transposed 1x1 conv weight tile
       part_ref:   (1, B, C2) f32         this core's partial  sum_hw(x) @ W^T
       hw_acc_ref: (B, c1_tile) f32       running spatial sum for the current C1 tile
       y_acc_ref:  (B, C2) f32            running conv accumulator (per core)
    """
    kc = pl.program_id(1)
    kh = pl.program_id(2)
    n_c1 = pl.num_programs(1)
    n_hw = pl.num_programs(2)

    @pl.when((kc == 0) & (kh == 0))
    def _():
        y_acc_ref[...] = jnp.zeros_like(y_acc_ref)

    @pl.when(kh == 0)
    def _():
        hw_acc_ref[...] = jnp.zeros_like(hw_acc_ref)

    x = x_ref[...]
    if mask_hw:
        # Ragged last spatial tile: out-of-bounds lanes hold garbage -> zero them.
        lane = jax.lax.broadcasted_iota(jnp.int32, x.shape, dimension=2)
        x = jnp.where(kh * hw_tile + lane < hw_total, x, jnp.zeros_like(x))

    # Partial spatial sum of this tile, accumulated in f32 (VPU filler under the DMA).
    hw_acc_ref[...] += jnp.sum(x, axis=-1, dtype=jnp.float32)

    # 1x1 conv dot hoisted out of the HW loop: one MXU push per C1 tile.
    @pl.when(kh == n_hw - 1)
    def _():
        y_acc_ref[...] += jnp.dot(hw_acc_ref[...], wT_ref[...],
                                  preferred_element_type=jnp.float32)

    @pl.when((kc == n_c1 - 1) & (kh == n_hw - 1))
    def _():
        part_ref[...] = y_acc_ref[...][None]


# ---------------------------------------------------------------------------
# phase 2: combine partials + folded BN + SiLU + lane-dense broadcast writeback
# ---------------------------------------------------------------------------
def _combine_broadcast_kernel(part_ref, scale_ref, bias_ref, o_ref):
    """part_ref: (n_par, B, C2) f32 partial sums; scale/bias: (1, C2) folded BN;
       o_ref: (B, C2, hw_tile) output tile.  The tiny elementwise work is free
       filler under the write-bound broadcast stores."""
    y = jnp.sum(part_ref[...], axis=0)              # combine per-core partials (B, C2)
    y = y * scale_ref[...] + bias_ref[...]          # BN affine (+ folded 1/(H*W) mean)
    y = y * jax.nn.sigmoid(y)                       # SiLU
    o_ref[...] = jnp.broadcast_to(y.astype(o_ref.dtype)[:, :, None], o_ref.shape)


# ---------------------------------------------------------------------------
# wrapper
# ---------------------------------------------------------------------------
def aspp_pooling(x, conv_w, bn_gamma, bn_beta, bn_mean, bn_var, eps=1e-3):
    """x: (B, C1, H, W) NCHW.  conv_w: (C2, C1, 1, 1).  Returns (B, C2, H, W)."""
    B, C1, H, W = x.shape
    C2 = conv_w.shape[0]
    HW = H * W
    itemsize = jnp.dtype(x.dtype).itemsize

    # --- glue: fold BN (eval) and the 1/(H*W) mean into scale/bias; pre-transpose W ---
    inv_std = 1.0 / jnp.sqrt(bn_var.astype(jnp.float32) + eps)
    bn_scale = bn_gamma.astype(jnp.float32) * inv_std                       # (C2,)
    bn_bias = bn_beta.astype(jnp.float32) - bn_mean.astype(jnp.float32) * bn_scale
    scale = (bn_scale / float(HW)).reshape(1, C2)        # absorbs the mean's 1/(H*W)
    bias = bn_bias.reshape(1, C2)
    wT = conv_w.reshape(C2, C1).T.astype(jnp.float32)                       # (C1, C2)

    # Lane-dense layout: spatial dims flattened onto the lane axis.
    x_flat = x.reshape(B, C1, HW)

    # --- phase 1 tiling: ~6 MiB x blocks (double-buffered by Pallas), safe on
    #     v5e (16 MiB default scoped), v6e and v7x (64 MiB physical) with the
    #     explicit 32 MiB vmem limit below. ---
    align = _sublane_align(x.dtype)
    budget = 6 * 1024 * 1024
    elems = max(128 * align, budget // (B * itemsize))
    hw_tile, mask_hw = _pick_hw_tile(HW, max(128, elems // align))
    c1_tile = _pick_tile(C1, align, max(align, elems // hw_tile))
    n_c1_total = max(1, C1 // c1_tile)
    n_hw = pl.cdiv(HW, hw_tile)

    # Megacore: split the C1 tiles across TensorCores via a leading 'parallel' axis
    # emitting per-core partial sums.  On 1-TC chips it just runs sequentially.
    n_par = 2 if (n_c1_total >= 2 and n_c1_total % 2 == 0) else 1
    n_c1 = n_c1_total // n_par

    kernel1 = functools.partial(_reduce_kernel,
                                hw_total=HW, hw_tile=hw_tile, mask_hw=mask_hw)

    partial_y = pl.pallas_call(
        kernel1,
        out_shape=jax.ShapeDtypeStruct((n_par, B, C2), jnp.float32),
        grid_spec=pltpu.PrefetchScalarGridSpec(
            num_scalar_prefetch=0,
            grid=(n_par, n_c1, n_hw),                   # spatial reduction axis last
            in_specs=[
                pl.BlockSpec((B, c1_tile, hw_tile),
                             lambda kp, kc, kh: (0, kp * n_c1 + kc, kh)),
                # weight tile only changes when kc changes -> fetched once per C1 tile
                pl.BlockSpec((c1_tile, C2),
                             lambda kp, kc, kh: (kp * n_c1 + kc, 0)),
            ],
            out_specs=pl.BlockSpec((1, B, C2), lambda kp, kc, kh: (kp, 0, 0)),
            scratch_shapes=[pltpu.VMEM((B, c1_tile), jnp.float32),
                            pltpu.VMEM((B, C2), jnp.float32)],
        ),
        compiler_params=pltpu.CompilerParams(
            dimension_semantics=("parallel", "arbitrary", "arbitrary"),
            vmem_limit_bytes=32 * 1024 * 1024),
        cost_estimate=pl.CostEstimate(
            flops=B * C1 * HW + 2 * B * C1 * C2,
            transcendentals=0,
            bytes_accessed=B * C1 * HW * itemsize + C1 * C2 * 4 + n_par * B * C2 * 4),
    )(x_flat, wT)

    # --- phase 2: combine + BN + SiLU + lane-dense broadcast writeback ---
    # NOTE: if the consumer could take the pooled (B, C2) activation directly, this
    # purely-redundant broadcast traffic could be dropped at the graph level.
    budget2 = 6 * 1024 * 1024
    elems2 = max(128, budget2 // (B * C2 * itemsize))
    hw_tile2, _ = _pick_hw_tile(HW, elems2)             # OOB writes of the ragged
    n_hw2 = pl.cdiv(HW, hw_tile2)                       # last block are discarded

    out_flat = pl.pallas_call(
        _combine_broadcast_kernel,
        out_shape=jax.ShapeDtypeStruct((B, C2, HW), x.dtype),
        grid_spec=pltpu.PrefetchScalarGridSpec(
            num_scalar_prefetch=0,
            grid=(n_hw2,),
            in_specs=[
                pl.BlockSpec((n_par, B, C2), lambda kh: (0, 0, 0)),
                pl.BlockSpec((1, C2), lambda kh: (0, 0)),
                pl.BlockSpec((1, C2), lambda kh: (0, 0)),
            ],
            out_specs=pl.BlockSpec((B, C2, hw_tile2), lambda kh: (0, 0, kh)),
        ),
        compiler_params=pltpu.CompilerParams(
            dimension_semantics=("parallel",),
            vmem_limit_bytes=32 * 1024 * 1024),
        cost_estimate=pl.CostEstimate(
            flops=4 * B * C2 * n_hw2,
            transcendentals=B * C2 * n_hw2,
            bytes_accessed=B * C2 * HW * itemsize + n_par * B * C2 * 4),
    )(partial_y, scale, bias)

    return out_flat.reshape(B, C2, H, W)


def aspp_pooling_ref(x, conv_w, bn_gamma, bn_beta, bn_mean, bn_var, eps=1e-3):
    """Pure-JAX reference for correctness check."""
    B, C1, H, W = x.shape
    C2 = conv_w.shape[0]
    pooled = jnp.mean(x.astype(jnp.float32), axis=(2, 3))                  # (B, C1)
    y = pooled @ conv_w.reshape(C2, C1).astype(jnp.float32).T              # (B, C2)
    s = bn_gamma / jnp.sqrt(bn_var + eps)
    y = y * s + (bn_beta - bn_mean * s)
    y = y * jax.nn.sigmoid(y)
    return jnp.broadcast_to(y[:, :, None, None], (B, C2, H, W)).astype(x.dtype)


if __name__ == "__main__":
    key = jax.random.PRNGKey(0)
    B, C1, C2, H, W = 2, 4, 8, 16, 16

    kx, kw = jax.random.split(key)
    x = jax.random.normal(kx, (B, C1, H, W), dtype=jnp.float32)
    # 1x1 conv weight (Conv2d inside ultralytics Conv has bias=False).
    conv_w = 0.1 * jax.random.normal(kw, (C2, C1, 1, 1), dtype=jnp.float32)
    # BatchNorm2d(c2) default init (eval mode): gamma=1, beta=0, mean=0, var=1.
    bn_gamma = jnp.ones((C2,), jnp.float32)
    bn_beta = jnp.zeros((C2,), jnp.float32)
    bn_mean = jnp.zeros((C2,), jnp.float32)
    bn_var = jnp.ones((C2,), jnp.float32)

    out = aspp_pooling(x, conv_w, bn_gamma, bn_beta, bn_mean, bn_var)
    out = jax.block_until_ready(out)

    ref = aspp_pooling_ref(x, conv_w, bn_gamma, bn_beta, bn_mean, bn_var)
    assert out.shape == (B, C2, H, W)
    assert jnp.allclose(out, ref, atol=1e-5, rtol=1e-5)
    print("KERNEL_OK")
</pallas_src>

<mosaic_0001>
module attributes {stable_mosaic.version = 11 : i64} {
  func.func @_reduce_kernel(%arg0: i32, %arg1: i32, %arg2: i32, %arg3: memref<2x4x256xf32, #tpu.memory_space<vmem>>, %arg4: memref<4x8xf32, #tpu.memory_space<vmem>>, %arg5: memref<1x2x8xf32, #tpu.memory_space<vmem>>, %arg6: memref<2x4xf32, #tpu.memory_space<vmem>>, %arg7: memref<2x8xf32, #tpu.memory_space<vmem>>) attributes {dimension_semantics = [#tpu.dimension_semantics<parallel>, #tpu.dimension_semantics<arbitrary>, #tpu.dimension_semantics<arbitrary>], iteration_bounds = array<i64: 1, 1, 1>, scalar_prefetch = 0 : i64, scratch_operands = 2 : i64, tpu.core_type = #tpu.core_type<tc>, window_params = [{transform_indices = @transform_0, window_bounds = array<i64: 2, 4, 256>}, {transform_indices = @transform_1, window_bounds = array<i64: 4, 8>}, {transform_indices = @transform_2, window_bounds = array<i64: 1, 2, 8>}]} {
    %c0_i32 = arith.constant 0 : i32
    %0 = arith.cmpi eq, %arg1, %c0_i32 : i32
    %c0_i32_0 = arith.constant 0 : i32
    %1 = arith.cmpi eq, %arg2, %c0_i32_0 : i32
    %2 = arith.andi %0, %1 : i1
    %3 = arith.extui %2 : i1 to i32
    %c0_i32_1 = arith.constant 0 : i32
    %4 = arith.cmpi ne, %3, %c0_i32_1 : i32
    scf.if %4 {
      %cst_15 = arith.constant 0.000000e+00 : f32
      %21 = vector.broadcast %cst_15 : f32 to vector<2x8xf32>
      %c0_16 = arith.constant 0 : index
      %c0_17 = arith.constant 0 : index
      %22 = vector.load %arg7[%c0_16, %c0_17] : memref<2x8xf32, #tpu.memory_space<vmem>>, vector<2x8xf32>
      tpu.vector_store %arg7[%c0_16, %c0_17], %21 {strides = array<i32>} : memref<2x8xf32, #tpu.memory_space<vmem>>, vector<2x8xf32>,
    } else {
    }
    %c0_i32_2 = arith.constant 0 : i32
    %5 = arith.cmpi eq, %arg2, %c0_i32_2 : i32
    %6 = arith.extui %5 : i1 to i32
    %c0_i32_3 = arith.constant 0 : i32
    %7 = arith.cmpi ne, %6, %c0_i32_3 : i32
    scf.if %7 {
      %cst_15 = arith.constant 0.000000e+00 : f32
      %21 = vector.broadcast %cst_15 : f32 to vector<2x4xf32>
      %c0_16 = arith.constant 0 : index
      %c0_17 = arith.constant 0 : index
      %22 = vector.load %arg6[%c0_16, %c0_17] : memref<2x4xf32, #tpu.memory_space<vmem>>, vector<2x4xf32>
      tpu.vector_store %arg6[%c0_16, %c0_17], %21 {strides = array<i32>} : memref<2x4xf32, #tpu.memory_space<vmem>>, vector<2x4xf32>,
    } else {
    }
    %c0 = arith.constant 0 : index
    %c0_4 = arith.constant 0 : index
    %c0_5 = arith.constant 0 : index
    %8 = vector.load %arg3[%c0, %c0_4, %c0_5] : memref<2x4x256xf32, #tpu.memory_space<vmem>>, vector<2x4x256xf32>
    %c0_6 = arith.constant 0 : index
    %c0_7 = arith.constant 0 : index
    %9 = vector.load %arg6[%c0_6, %c0_7] : memref<2x4xf32, #tpu.memory_space<vmem>>, vector<2x4xf32>
    %cst = arith.constant dense<0.000000e+00> : vector<2x4xf32>
    %10 = vector.multi_reduction <add>, %8, %cst [2] : vector<2x4x256xf32> to vector<2x4xf32>
    %11 = arith.addf %9, %10 : vector<2x4xf32>
    %c0_8 = arith.constant 0 : index
    %c0_9 = arith.constant 0 : index
    %12 = vector.load %arg6[%c0_8, %c0_9] : memref<2x4xf32, #tpu.memory_space<vmem>>, vector<2x4xf32>
    tpu.vector_store %arg6[%c0_8, %c0_9], %11 {strides = array<i32>} : memref<2x4xf32, #tpu.memory_space<vmem>>, vector<2x4xf32>,
    %c0_i32_10 = arith.constant 0 : i32
    %13 = arith.cmpi eq, %arg2, %c0_i32_10 : i32
    %14 = arith.extui %13 : i1 to i32
    %c0_i32_11 = arith.constant 0 : i32
    %15 = arith.cmpi ne, %14, %c0_i32_11 : i32
    scf.if %15 {
      %c0_15 = arith.constant 0 : index
      %c0_16 = arith.constant 0 : index
      %21 = vector.load %arg7[%c0_15, %c0_16] : memref<2x8xf32, #tpu.memory_space<vmem>>, vector<2x8xf32>
      %c0_17 = arith.constant 0 : index
      %c0_18 = arith.constant 0 : index
      %22 = vector.load %arg6[%c0_17, %c0_18] : memref<2x4xf32, #tpu.memory_space<vmem>>, vector<2x4xf32>
      %c0_19 = arith.constant 0 : index
      %c0_20 = arith.constant 0 : index
      %23 = vector.load %arg4[%c0_19, %c0_20] : memref<4x8xf32, #tpu.memory_space<vmem>>, vector<4x8xf32>
      %cst_21 = arith.constant dense<0.000000e+00> : vector<2x8xf32>
      %24 = tpu.matmul %22, %23, %cst_21 {dimension_numbers = #tpu.dot_dimension_numbers<[1], [0], [0], [1], [0, 0, 1, 1], [], []>} : vector<2x4xf32>, vector<4x8xf32>, vector<2x8xf32> -> vector<2x8xf32>
      %25 = arith.addf %21, %24 : vector<2x8xf32>
      %c0_22 = arith.constant 0 : index
      %c0_23 = arith.constant 0 : index
      %26 = vector.load %arg7[%c0_22, %c0_23] : memref<2x8xf32, #tpu.memory_space<vmem>>, vector<2x8xf32>
      tpu.vector_store %arg7[%c0_22, %c0_23], %25 {strides = array<i32>} : memref<2x8xf32, #tpu.memory_space<vmem>>, vector<2x8xf32>,
    } else {
    }
    %c0_i32_12 = arith.constant 0 : i32
    %16 = arith.cmpi eq, %arg1, %c0_i32_12 : i32
    %c0_i32_13 = arith.constant 0 : i32
    %17 = arith.cmpi eq, %arg2, %c0_i32_13 : i32
    %18 = arith.andi %16, %17 : i1
    %19 = arith.extui %18 : i1 to i32
    %c0_i32_14 = arith.constant 0 : i32
    %20 = arith.cmpi ne, %19, %c0_i32_14 : i32
    scf.if %20 {
      %c0_15 = arith.constant 0 : index
      %c0_16 = arith.constant 0 : index
      %21 = vector.load %arg7[%c0_15, %c0_16] : memref<2x8xf32, #tpu.memory_space<vmem>>, vector<2x8xf32>
      %22 = vector.shape_cast %21 : vector<2x8xf32> to vector<1x2x8xf32>
      %c0_17 = arith.constant 0 : index
      %c0_18 = arith.constant 0 : index
      %c0_19 = arith.constant 0 : index
      %23 = vector.load %arg5[%c0_17, %c0_18, %c0_19] : memref<1x2x8xf32, #tpu.memory_space<vmem>>, vector<1x2x8xf32>
      tpu.vector_store %arg5[%c0_17, %c0_18, %c0_19], %22 {strides = array<i32>} : memref<1x2x8xf32, #tpu.memory_space<vmem>>, vector<1x2x8xf32>,
    } else {
    }
    return
  }
  func.func @transform_0(%arg0: i32, %arg1: i32, %arg2: i32) -> (i32, i32, i32) {
    %c1_i32 = arith.constant 1 : i32
    %0 = arith.muli %arg0, %c1_i32 : i32
    %1 = arith.addi %0, %arg1 : i32
    %c0_i32 = arith.constant 0 : i32
    %c0_i32_0 = arith.constant 0 : i32
    return %c0_i32, %1, %arg2 : i32, i32, i32
  }
  func.func @transform_1(%arg0: i32, %arg1: i32, %arg2: i32) -> (i32, i32) {
    %c1_i32 = arith.constant 1 : i32
    %0 = arith.muli %arg0, %c1_i32 : i32
    %1 = arith.addi %0, %arg1 : i32
    %c0_i32 = arith.constant 0 : i32
    %c0_i32_0 = arith.constant 0 : i32
    return %1, %c0_i32 : i32, i32
  }
  func.func @transform_2(%arg0: i32, %arg1: i32, %arg2: i32) -> (i32, i32, i32) {
    %c0_i32 = arith.constant 0 : i32
    %c0_i32_0 = arith.constant 0 : i32
    %c0_i32_1 = arith.constant 0 : i32
    return %arg0, %c0_i32, %c0_i32_0 : i32, i32, i32
  }
}

</mosaic_0001>

<bundles_post_ra>
// kernel: tpu_custom_call.1
= control target key start
LH: loop header
LB: loop body
LE: loop exit
PB: predicated region body
PF: predicated region fallthrough
CT: control target
= control target key end

     0   :  { %7 = vsyncpa [#allocation5], 0  ;;  %s363_s0 = inlined_call_operand.hbm [shape: f32[2,4,256], index: 0, kind: input, shape index: {}]   ;;  %s364_s1 = inlined_call_operand.hbm [shape: f32[4,8], index: 1, kind: input, shape index: {}]   ;;  %s365_s2 = inlined_call_operand.hbm [shape: f32[1,2,8], index: 2, kind: output, shape index: {}]  }
   0x1   :  { %8 = vsyncpa [#allocation8], 0 }
   0x2   :  { %9 = vsyncpa [#allocation6], 0  ;;  %s295_s9 = smov [#allocation4]   ;;  %s223_s13 = scalar_lea.hbm %s363_s0, 256 }
   0x3   :  { %s19_s10 = sshll.u32 %s295_s9, 4  ;;  %p224_p0 = scmp.ne.s32.totalorder %s363_s0, %s223_s13  ;;  %s20_s10 = int_to_ptr.vmem [resolvable:$true] %s19_s10 }
   0x4   :  { %p227_p1 = scmp.lt.u32.totalorder %s223_s13, %s363_s0 }
   0x6   :  { %p229_p2 = pnand %p227_p1, %p224_p0 }
   0x8   :  { %232 = shalt.err (!%p229_p2)
}
   0x9   :  { %s233_s18 = scalar_lea.vmem %s20_s10, 256  ;;  %p238_p4 = scmp.lt.s32.totalorder %s20_s10, %s20_s10 }
   0xa   :  { %p234_p3 = scmp.ne.s32.totalorder %s20_s10, %s233_s18  ;;  %p239_p5 = scmp.lt.s32.totalorder %s233_s18, %s233_s18 }
   0xc   :  { %p240_p6 = por %p239_p5, %p238_p4 }
   0xe   :  { %p241_p7 = pnand %p240_p6, %p234_p3 }
  0x10   :  { %244 = shalt.err (!%p241_p7)
}
  0x11   :  { %s296_s19 = smov 128   ;;  %s297_s20 = smov 8  }
  0x12   :  { %25 = dma.hbm_to_vmem [thread:$0]  %s363_s0, 256, %s20_s10, [#allocation5], %s296_s19, %s296_s19, %s297_s20  }
  0x13   :  { %s298_s23 = smov [#allocation7]   ;;  %s245_s27 = scalar_lea.hbm %s364_s1, 64 }
  0x14   :  { %s35_s24 = sshll.u32 %s298_s23, 4  ;;  %p246_p8 = scmp.ne.s32.totalorder %s364_s1, %s245_s27  ;;  %s36_s24 = int_to_ptr.vmem [resolvable:$true] %s35_s24 }
  0x15   :  { %p249_p9 = scmp.lt.u32.totalorder %s245_s27, %s364_s1 }
  0x17   :  { %p251_p10 = pnand %p249_p9, %p246_p8 }
  0x19   :  { %254 = shalt.err (!%p251_p10)
}
  0x1a   :  { %s255_s4 = scalar_lea.vmem %s36_s24, 64  ;;  %p260_p12 = scmp.lt.s32.totalorder %s36_s24, %s36_s24 }
  0x1b   :  { %p256_p11 = scmp.ne.s32.totalorder %s36_s24, %s255_s4  ;;  %p261_p13 = scmp.lt.s32.totalorder %s255_s4, %s255_s4 }
  0x1d   :  { %p262_p0 = por %p261_p13, %p260_p12 }
  0x1f   :  { %p263_p1 = pnand %p262_p0, %p256_p11 }
  0x21   :  { %266 = shalt.err (!%p263_p1)
}
  0x22   :  { %38 = dma.hbm_to_vmem [thread:$0]  %s364_s1, 64, %s36_s24, [#allocation8]  }
  0x23   :  { %289 = dma.done.wait [#allocation5], 256  }
  0x24   :  { %290 = vsyncadd [#allocation5], 4294967040 }
  0x25   :  { %291 = dma.done.wait [#allocation8], 64  }
  0x26   :  { %292 = vsyncadd [#allocation8], 4294967232  ;;  %vm69_vm0 = vcmask 1043456   ;;  %v60_v0 = vld [vmem:[#allocation4] sm:$0xff]  ;;  %v61_v1 = vld [vmem:[#allocation4 + $0x8] sm:$0xff]  ;;  %vm58_vm1 = vcmask 25600   ;;  %v82_v12 = vlaneseq }
  0x27   :  { %v65_v2 = vcombine.high %v60_v0, %v60_v0  ;;  %v70_v3 = vsel %vm69_vm0, %v60_v0, 0.0  ;;  %v66_v4 = vcombine.high %v61_v1, %v61_v1  ;;  %v75_v6 = vsel %vm69_vm0, %v61_v1, 0.0  ;;  %v103_v11 = vld [vmem:[#allocation7] sm:$0xf]  ;;  %s301_s1 = smov [#allocation9]  }
  0x28   :  { %v299_v10 = vmov 0.0   ;;  %vm300_vm2 = vmmov 0   ;;  %vm53_vm3 = vcmask 58368   ;;  %v83_v13 = vand.u32 127, %v82_v12  ;;  %s195_s6 = sshll.u32 %s301_s1, 4  ;;  %s196_s6 = int_to_ptr.vmem [resolvable:$true] %s195_s6 }
  0x29   :  { %v71_v5 = vsel %vm69_vm0, %v65_v2, 0.0  ;;  %v76_v7 = vsel %vm69_vm0, %v66_v4, 0.0  ;;  %59 = vst.msk [vmem:[#allocation2] sm:$0x3] %vm58_vm1, %v299_v10  ;;  %209 = vmatprep.subr.mxu0 %v299_v10  ;;  %211 = vmatprep.mubr.msk.f32.mxu0 %vm300_vm2, %v299_v10  ;;  %v85_v14 = vshrl.u32 %v82_v12, 7  ;;  %vm92_vm4 = vcmask 1041409   ;;  %p272_p3 = scmp.lt.s32.totalorder %s196_s6, %s196_s6 }
  0x2a   :  { %v72_v8 = vadd.f32 %v71_v5, %v70_v3  ;;  %v77_v9 = vadd.f32 %v76_v7, %v75_v6  ;;  %210 = vmatpush3.msk.msra.mxu0 %vm69_vm0, %v103_v11  ;;  %54 = vst.msk [vmem:[#allocation3] sm:$0x3] %vm53_vm3, %v299_v10  ;;  %vm104_vm5 = vcmask 31744   ;;  %s267_s7 = scalar_lea.vmem %s196_s6, 32 }
  0x2b   :  { %v86_v16 = vsub.s32 %v83_v13, %v85_v14  ;;  %p268_p2 = scmp.ne.s32.totalorder %s196_s6, %s267_s7  ;;  %p273_p4 = scmp.lt.s32.totalorder %s267_s7, %s267_s7 }
  0x2c   :  { %73 = vadd.xlane.f32.xlu0 %v72_v8 }
  0x2d   :  { %p274_p5 = por %p273_p4, %p272_p3 }
  0x2f   :  { %p275_p6 = pnand %p274_p5, %p268_p2 }
  0x30   :  { %78 = vadd.xlane.f32.xlu0 %v77_v9  ;;  %v62_v20 = vld [vmem:[#allocation2] sm:$0x3] }
  0x31   :  { %v101_v24 = vld [vmem:[#allocation3] sm:$0x3] }
  0xb9   :  { %v74_v15 = vpop.xlane.xlu0 %73 }
  0xba   :  { %v87_v18 = vrot.slane %v74_v15, %v86_v16 }
  0xbd   :  { %v79_v17 = vpop.xlane.xlu0 %78 }
  0xbe   :  { %v91_v19 = vrot.slane %v79_v17, %v86_v16 }
  0xc0   :  { %v93_v21 = vsel %vm92_vm4, %v91_v19, %v87_v18 }
  0xc1   :  { %v95_v22 = vadd.f32 %v93_v21, %v62_v20 }
  0xc3   :  { %97 = vst.msk [vmem:[#allocation2] sm:$0x3] %vm58_vm1, %v95_v22 }
  0xca   :  { %v102_v23 = vld [vmem:[#allocation2] sm:$0x3] }
  0xcb   :  { %212 = vmatmul.mubr.msk.f32.vlgmr.msra.gmra.mrb[0].mxu0 %vm104_vm5, %v102_v23 }
 0x19e   :  { %v177_v25 = vpop.f32.mrb[0].mxu0 }
 0x19f   :  { %v181_v26 = vadd.f32 %v177_v25, %v101_v24  ;;  %v213_v27 = vpop.f32.mrb[1].mxu0 }
 0x1a1   :  { %183 = vst.msk [vmem:[#allocation3] sm:$0x3] %vm53_vm3, %v181_v26 }
 0x1a8   :  { %v186_v28 = vld [vmem:[#allocation3] sm:$0x3] }
 0x1a9   :  { %188 = vst.msk [vmem:[#allocation9] sm:$0x3] %vm53_vm3, %v186_v28 }
 0x1aa   :  { %278 = shalt.err (!%p275_p6)
}
 0x1ab   :  { %s279_s10 = scalar_lea.hbm %s365_s2, 32 }
 0x1ac   :  { %p280_p7 = scmp.ne.s32.totalorder %s365_s2, %s279_s10  ;;  %p283_p8 = scmp.lt.u32.totalorder %s279_s10, %s365_s2 }
 0x1ae   :  { %p285_p9 = pnand %p283_p8, %p280_p7 }
 0x1b0   :  { %288 = shalt.err (!%p285_p9)
}
 0x1b1   :  { %198 = dma.vmem_to_hbm [thread:$0]  %s196_s6, 32, %s365_s2, [#allocation6]  }
 0x1b2   :  { %293 = dma.done.wait [#allocation6], 32  }
 0x1b3   :  { %294 = vsyncadd [#allocation6], 4294967264 }
 0x1b4   :  { %202 = vsyncpa [#allocation5], 1 }
 0x1b5   :  { %203 = vsyncpa [#allocation8], 1 }
 0x1b6   :  { %204 = vsyncpa [#allocation6], 1 }

</bundles_post_ra>
